<compile_context>
chip_gen: v7x
topology: tpu7x:2x2x1
jax: 0.10.0
libtpu: 0.0.40
codegen_flags: <defaults>
</compile_context>

<pallas_src>
import jax
import jax.numpy as jnp
from jax.experimental import pallas as pl
from jax.experimental.pallas import tpu as pltpu


def _round_up(x: int, m: int) -> int:
    return ((x + m - 1) // m) * m


def _linear_encoder_kernel(x_ref, w_ref, b_ref, o_ref):
    # x_ref: (TM, D) f32 (native input dtype)   w_ref: (D, E) compute dtype
    # b_ref: (1, E) f32                         o_ref: (TM, E) out dtype
    # Cast activations to the compute dtype in-kernel (VPU slot has huge
    # slack vs. DMA on this mem-bound op), accumulate on the MXU in f32.
    x = x_ref[...].astype(w_ref.dtype)
    acc = jnp.dot(x, w_ref[...], preferred_element_type=jnp.float32)
    o_ref[...] = (acc + b_ref[...]).astype(o_ref.dtype)


def _pick_tile_m(M: int, D: int, E: int, out_bytes: int, tile_m_max: int) -> int:
    # VMEM footprint per row of the double-buffered input + output blocks.
    # Blocks pad their lane (last) dim to a multiple of 128 in VMEM.
    lane_d = max(_round_up(D, 128), 128)
    lane_e = max(_round_up(E, 128), 128)
    per_row = 2 * (lane_d * 4 + lane_e * out_bytes)  # f32 input block + out block
    budget = 24 * 1024 * 1024  # fits v7x's 64 MiB physical VMEM with headroom
    tile_budget = max(budget // per_row, 16)
    # Guarantee >= 4 grid steps: shards the "parallel" axis across v7x's two
    # TensorCores and leaves steps for DMA overlap on v5e/v6e too.
    tile_multicore = _round_up(pl.cdiv(M, 4), 16)
    tile_m = min(tile_m_max, tile_budget, tile_multicore)
    # Multiple of 16 rows (bf16 packs 16 rows per sublane tile).
    return max((tile_m // 16) * 16, 16)


def traj_encoder_forward(
    seq,
    time_idxs,
    w,
    b,
    hidden_state=None,
    *,
    tile_m: int = 2048,
    compute_dtype=jnp.bfloat16,
    out_dtype=None,
    min_pallas_rows: int = 256,
):
    """Concrete TrajEncoder.forward: per-timestep linear embedding.

    seq:       (B, L, tstep_dim)
    time_idxs: (B, L) int32   (unused by this minimal encoder)
    w:         (tstep_dim, emb_dim)
    b:         (emb_dim,)
    compute_dtype: MXU input dtype (bf16 default; pass jnp.float32 for
                   f32-accurate embeddings).
    out_dtype: embedding dtype; defaults to seq.dtype.  Pass jnp.bfloat16 if
               the downstream consumer runs in bf16 (halves output traffic).
    returns (emb, hidden_state) with emb: (B, L, emb_dim)
    """
    del time_idxs  # base-class interface arg; unused in linear concretization
    B, L, D = seq.shape
    E = w.shape[1]
    M = B * L
    out_dtype = seq.dtype if out_dtype is None else out_dtype
    out_bytes = jnp.dtype(out_dtype).itemsize
    comp_bytes = jnp.dtype(compute_dtype).itemsize

    x2d = seq.reshape(M, D)                 # keep native dtype; cast in-kernel
    w_c = w.astype(compute_dtype)
    b2d = b.reshape(1, E).astype(jnp.float32)

    # Tiny workloads: pallas_call launch + pipeline overhead dwarfs the data
    # moved — use a single fused XLA dot instead.
    if M < min_pallas_rows:
        acc = (
            jnp.dot(x2d.astype(compute_dtype), w_c, preferred_element_type=jnp.float32)
            + b2d
        )
        return acc.astype(out_dtype).reshape(B, L, E), hidden_state

    tile_m = _pick_tile_m(M, D, E, out_bytes, tile_m)
    n_tiles = pl.cdiv(M, tile_m)

    cost = pl.CostEstimate(
        flops=2 * M * D * E,
        transcendentals=0,
        bytes_accessed=(
            M * D * seq.dtype.itemsize   # f32 input read (in-kernel cast)
            + D * E * comp_bytes         # resident weight
            + E * 4                      # bias
            + M * E * out_bytes          # output write
        ),
    )

    out2d = pl.pallas_call(
        _linear_encoder_kernel,
        out_shape=jax.ShapeDtypeStruct((M, E), out_dtype),
        grid_spec=pl.GridSpec(
            grid=(n_tiles,),
            in_specs=[
                # Partial last block is handled by Pallas: OOB input rows are
                # unspecified, OOB output rows dropped on writeback.
                pl.BlockSpec((tile_m, D), lambda i: (i, 0)),
                # Invariant index maps: weight / bias stay resident in VMEM
                # across the whole grid (no per-step re-DMA).
                pl.BlockSpec((D, E), lambda i: (0, 0)),
                pl.BlockSpec((1, E), lambda i: (0, 0)),
            ],
            out_specs=pl.BlockSpec((tile_m, E), lambda i: (i, 0)),
        ),
        compiler_params=pltpu.CompilerParams(
            dimension_semantics=("parallel",),
            # Raise v5e's 16 MiB scoped default; still well under v7x's
            # 64 MiB physical VMEM (our block budget is ~24 MiB).
            vmem_limit_bytes=32 * 1024 * 1024,
        ),
        cost_estimate=cost,
    )(x2d, w_c, b2d)

    emb = out2d.reshape(B, L, E)
    return emb, hidden_state


if __name__ == "__main__":
    # Small shapes consistent with the module's interface.  M = B*L = 800 is
    # not a multiple of tile_m, so the masked-tail path is exercised and the
    # grid has >= 4 steps.
    batch, seq_len, tstep_dim, emb_dim = 4, 200, 32, 128

    key = jax.random.PRNGKey(0)
    k_seq, k_w, k_b = jax.random.split(key, 3)

    seq = jax.random.normal(k_seq, (batch, seq_len, tstep_dim), dtype=jnp.float32)
    time_idxs = jnp.broadcast_to(
        jnp.arange(seq_len, dtype=jnp.int32)[None, :], (batch, seq_len)
    )

    # Deterministic parameter init (synthetic; no checkpoint loading).
    w = jax.random.normal(k_w, (tstep_dim, emb_dim), dtype=jnp.float32) * 0.02
    b = jax.random.normal(k_b, (emb_dim,), dtype=jnp.float32) * 0.01

    emb, hidden = traj_encoder_forward(seq, time_idxs, w, b, hidden_state=None)
    emb = jax.block_until_ready(emb)

    assert emb.shape == (batch, seq_len, emb_dim)
    assert hidden is None

    # Reference 1: precision-matched (bf16 inputs, f32 accumulate) — tight tol.
    x2d = seq.reshape(-1, tstep_dim).astype(jnp.bfloat16)
    ref_bf16 = (
        jnp.dot(x2d, w.astype(jnp.bfloat16), preferred_element_type=jnp.float32)
        + b[None, :]
    ).astype(jnp.float32).reshape(batch, seq_len, emb_dim)
    assert jnp.allclose(emb, ref_bf16, atol=1e-3, rtol=1e-3)

    # Reference 2: full-f32 math — loose tolerance (bf16-input rounding).
    ref_f32 = (seq.reshape(-1, tstep_dim) @ w + b).reshape(batch, seq_len, emb_dim)
    assert jnp.allclose(emb, ref_f32, atol=2e-2, rtol=2e-2)

    # Also exercise the optional bf16-output path.
    emb_bf16, _ = traj_encoder_forward(
        seq, time_idxs, w, b, hidden_state=None, out_dtype=jnp.bfloat16
    )
    emb_bf16 = jax.block_until_ready(emb_bf16)
    assert emb_bf16.dtype == jnp.bfloat16
    assert jnp.allclose(emb_bf16.astype(jnp.float32), ref_f32, atol=5e-2, rtol=5e-2)

    print("KERNEL_OK")
</pallas_src>

<mosaic_0001>
module attributes {stable_mosaic.version = 11 : i64} {
  func.func @_linear_encoder_kernel(%arg0: i32, %arg1: memref<208x32xf32, #tpu.memory_space<vmem>>, %arg2: memref<32x128xbf16, #tpu.memory_space<vmem>>, %arg3: memref<1x128xf32, #tpu.memory_space<vmem>>, %arg4: memref<208x128xf32, #tpu.memory_space<vmem>>) attributes {dimension_semantics = [#tpu.dimension_semantics<parallel>], iteration_bounds = array<i64: 4>, scalar_prefetch = 0 : i64, scratch_operands = 0 : i64, tpu.core_type = #tpu.core_type<tc>, window_params = [{transform_indices = @transform_0, window_bounds = array<i64: 208, 32>}, {pipeline_mode = #tpu.pipeline_mode<synchronous>, transform_indices = @transform_1, window_bounds = array<i64: 32, 128>}, {pipeline_mode = #tpu.pipeline_mode<synchronous>, transform_indices = @transform_2, window_bounds = array<i64: 1, 128>}, {transform_indices = @transform_3, window_bounds = array<i64: 208, 128>}]} {
    %c0 = arith.constant 0 : index
    %c0_0 = arith.constant 0 : index
    %0 = vector.load %arg1[%c0, %c0_0] : memref<208x32xf32, #tpu.memory_space<vmem>>, vector<208x32xf32>
    %1 = arith.truncf %0 : vector<208x32xf32> to vector<208x32xbf16>
    %c0_1 = arith.constant 0 : index
    %c0_2 = arith.constant 0 : index
    %2 = vector.load %arg2[%c0_1, %c0_2] : memref<32x128xbf16, #tpu.memory_space<vmem>>, vector<32x128xbf16>
    %cst = arith.constant dense<0.000000e+00> : vector<208x128xf32>
    %3 = tpu.matmul %1, %2, %cst {dimension_numbers = #tpu.dot_dimension_numbers<[1], [0], [0], [1], [0, 0, 1, 1], [], []>} : vector<208x32xbf16>, vector<32x128xbf16>, vector<208x128xf32> -> vector<208x128xf32>
    %c0_3 = arith.constant 0 : index
    %c0_4 = arith.constant 0 : index
    %4 = vector.load %arg3[%c0_3, %c0_4] : memref<1x128xf32, #tpu.memory_space<vmem>>, vector<1x128xf32>
    %5 = vector.broadcast %4 : vector<1x128xf32> to vector<208x128xf32>
    %6 = arith.addf %3, %5 : vector<208x128xf32>
    %c0_5 = arith.constant 0 : index
    %c0_6 = arith.constant 0 : index
    %7 = vector.load %arg4[%c0_5, %c0_6] : memref<208x128xf32, #tpu.memory_space<vmem>>, vector<208x128xf32>
    tpu.vector_store %arg4[%c0_5, %c0_6], %6 {strides = array<i32>} : memref<208x128xf32, #tpu.memory_space<vmem>>, vector<208x128xf32>,
    return
  }
  func.func @transform_0(%arg0: i32) -> (i32, i32) {
    %c0_i32 = arith.constant 0 : i32
    %c0_i32_0 = arith.constant 0 : i32
    return %arg0, %c0_i32 : i32, i32
  }
  func.func @transform_1(%arg0: i32) -> (i32, i32) {
    %c0_i32 = arith.constant 0 : i32
    %c0_i32_0 = arith.constant 0 : i32
    %c0_i32_1 = arith.constant 0 : i32
    return %c0_i32, %c0_i32_0 : i32, i32
  }
  func.func @transform_2(%arg0: i32) -> (i32, i32) {
    %c0_i32 = arith.constant 0 : i32
    %c0_i32_0 = arith.constant 0 : i32
    %c0_i32_1 = arith.constant 0 : i32
    return %c0_i32, %c0_i32_0 : i32, i32
  }
  func.func @transform_3(%arg0: i32) -> (i32, i32) {
    %c0_i32 = arith.constant 0 : i32
    %c0_i32_0 = arith.constant 0 : i32
    return %arg0, %c0_i32 : i32, i32
  }
}

</mosaic_0001>

<bundles_post_ra>
// kernel: tpu_custom_call.1
= control target key start
LH: loop header
LB: loop body
LE: loop exit
PB: predicated region body
PF: predicated region fallthrough
CT: control target
= control target key end

     0   :  { %8 = vsyncpa [#allocation3], 0  ;;  %s1040_s0 = inlined_call_operand.vmem [shape: f32[800,32], index: 0, kind: input, shape index: {}]   ;;  %s1041_s1 = inlined_call_operand.vmem [shape: bf16[32,128], index: 1, kind: input, shape index: {}]   ;;  %s1042_s2 = inlined_call_operand.vmem [shape: f32[1,128], index: 2, kind: input, shape index: {}]   ;;  %s1043_s3 = inlined_call_operand.hbm [shape: f32[800,128], index: 3, kind: output, shape index: {}]  }
   0x1   :  { %10 = vsyncpa [#allocation3 + $0x1], 0  ;;  %s782_s12 = smov 0   ;;  %s784_s13 = smov 0  }
   0x2   :  { %s786_s14 = smov 0   ;;  %s788_s15 = smov 0  }
   0x3 LB: > { %s803_s16 = sadd.s32 4294967295, %s755_s15   ;;  %s544_s17 = sadd.s32 4294967294, %s755_s15   ;;  %s755_s15 = sphi %s788_s15, %s1049_s15   ;;  %s751_s14 = sphi %s786_s14, %s1048_s14   ;;  %s747_s13 = sphi %s784_s13, %s1047_s13   ;;  %s743_s12 = sphi %s782_s12, %s1046_s12  }
   0x4   : > { %s807_s18 = sadd.s32 1, %s755_s15   ;;  %s91_s19 = sadd.s32 1, %s751_s14 }
   0x5   : > { %s88_s20 = ssub.s32 %s755_s15, %s807_s18  ;;  %p101_p0 = scmp.ne.s32.totalorder %s751_s14, %s747_s13 }
   0x6   : > { %p89_p1 = scmp.eq.s32.totalorder %s88_s20, 0  ;;  %p102_p2 = scmp.eq.s32.totalorder %s803_s16, 3 }
   0x7   : > { %p107_p3 = scmp.ne.s32.totalorder %s747_s13, %s743_s12  ;;  %p108_p4 = scmp.eq.s32.totalorder %s544_s17, 3 }
   0x8   : > { %s818_s21 = scalar_select %p89_p1, %s751_s14, %s91_s19  }
   0x9   : > { %p820_p5 = por %p102_p2, %p101_p0  ;;  %p824_p6 = por %p108_p4, %p107_p3 }
   0xa   : > { %p547_p7 = scmp.ge.s32.totalorder %s755_s15, 1  ;;  %p149_p8 = scmp.lt.s32.totalorder %s755_s15, 5 }
   0xc   : > { %p150_p9 = pnand %p547_p7, %p149_p8 }
   0xd   : > { %v691_v0 = vld [vmem:[%s1041_s1] sm:$0xff] (!%p150_p9)   ;;  %v757_v1 = vmov (!%p150_p9), 0.0   ;;  %v692_v2 = vld [vmem:[%s1041_s1 + $0x8] sm:$0xff] (!%p150_p9)   ;;  %s839_s28 = smul.u32 (!%p150_p9), 26, %s803_s16  ;;  %vm758_vm0 = vmmov (!%p150_p9), 0   ;;  %vm259_vm1 = vcmask (!%p150_p9), 261120  }
   0xe   : > { %153 = sbr.rel (%p150_p9) target bundleno = 321 (0x141), region = 32  ;;  %588 = vmatprep.subr.bf16.mxu0 (!%p150_p9), %v757_v1  ;;  %644 = vmatprep.subr.bf16.mxu1 (!%p150_p9), %v757_v1  ;;  %s174_s7 = sand.u32 (!%p150_p9), 1, %s747_s13   ;;  %v921_v42 = vld [vmem:[%s1042_s2] ss:$0 sm:$0xff] (!%p150_p9) }
   0xf   : > { %589 = vmatpush3.bf16.msra.mxu0 (!%p150_p9), %v691_v0  ;;  %646 = vmatpush3.bf16.msra.mxu1 (!%p150_p9), %v691_v0  ;;  %p182_p10 = scmp.lt.s32.totalorder (!%p150_p9), %s839_s28, 99  ;;  %s648_s8 = smul.u32 (!%p150_p9), 208, %s174_s7 }
  0x10   : > { %590 = vmatprep.subr.bf16.mxu0 (!%p150_p9), %v757_v1  ;;  %592 = vmatprep.mubr.msk.bf16.mxu0 (!%p150_p9), %vm758_vm0, %v757_v1  ;;  %s979_s17 = scalar_lea.sflag (!%p150_p9), [#allocation3], %s174_s7 }
  0x11   : > { %645 = vmatprep.subr.bf16.mxu1 (!%p150_p9), %v757_v1  ;;  %620 = vmatprep.mubr.msk.bf16.mxu1 (!%p150_p9), %vm758_vm0, %v757_v1  ;;  %s925_s11 = scalar_lea.vmem (!%p150_p9), [#allocation2], %s648_s8 }
  0x13   : > { %591 = vmatpush3.bf16.msra.mxu0 (!%p150_p9), %v692_v2  ;;  %647 = vmatpush3.bf16.msra.mxu1 (!%p150_p9), %v692_v2 }
  0x15   : > { %s183_s29 = scalar_select %p182_p10, %s839_s28, 99 }
  0x16   : > { %s471_s19 = ssub.s32 (%p820_p5), 100, %s839_s28 }
  0x17   : > { %s548_s30 = sshll.u32 %s183_s29, 3  ;;  %p472_p11 = scmp.lt.s32.totalorder (%p820_p5), %s471_s19, 26 }
  0x18   : > { %s852_s6 = scalar_lea.vmem %s1040_s0, %s548_s30 }
  0x19   : > { %v197_v3 = vld [vmem:[%s852_s6] sm:$0xff]  ;;  %v198_v4 = vld [vmem:[%s852_s6 + $0x8] sm:$0xff]  ;;  %v211_v5 = vld [vmem:[%s852_s6 + $0x70] sm:$0xff] }
  0x1a   : > { %v223_v6 = vpack.c.bf16 %v198_v4, %v197_v3  ;;  %v212_v7 = vld [vmem:[%s852_s6 + $0x78] sm:$0xff]  ;;  %v199_v9 = vld [vmem:[%s852_s6 + $0x10] sm:$0xff]  ;;  %v213_v11 = vld [vmem:[%s852_s6 + $0x80] sm:$0xff] }
  0x1b   : > { %v230_v8 = vpack.c.bf16 %v212_v7, %v211_v5  ;;  %v200_v10 = vld [vmem:[%s852_s6 + $0x18] sm:$0xff]  ;;  %v214_v12 = vld [vmem:[%s852_s6 + $0x88] sm:$0xff]  ;;  %v201_v15 = vld [vmem:[%s852_s6 + $0x20] sm:$0xff] }
  0x1c   : > { %593 = vmatmul.mubr.msk.bf16.vlgmr.msra.gmra.mrb[0].mxu0 %vm259_vm1, %v223_v6  ;;  %v224_v13 = vpack.c.bf16 %v200_v10, %v199_v9  ;;  %v231_v14 = vpack.c.bf16 %v214_v12, %v213_v11  ;;  %v202_v16 = vld [vmem:[%s852_s6 + $0x28] sm:$0xff]  ;;  %v215_v17 = vld [vmem:[%s852_s6 + $0x90] sm:$0xff]  ;;  %v216_v18 = vld [vmem:[%s852_s6 + $0x98] sm:$0xff] }
  0x1d   : > { %621 = vmatmul.mubr.msk.bf16.vlgmr.msra.gmra.mrb[0].mxu1 %vm259_vm1, %v230_v8  ;;  %596 = vmatprep.mubr.msk.bf16.mxu0 %vm758_vm0, %v757_v1  ;;  %v225_v19 = vpack.c.bf16 %v202_v16, %v201_v15  ;;  %v232_v20 = vpack.c.bf16 %v216_v18, %v215_v17  ;;  %v203_v21 = vld [vmem:[%s852_s6 + $0x30] sm:$0xff]  ;;  %v204_v22 = vld [vmem:[%s852_s6 + $0x38] sm:$0xff]  ;;  %v217_v23 = vld [vmem:[%s852_s6 + $0xa0] sm:$0xff] }
  0x1e   : > { %624 = vmatprep.mubr.msk.bf16.mxu1 %vm758_vm0, %v757_v1  ;;  %v218_v24 = vld [vmem:[%s852_s6 + $0xa8] sm:$0xff]  ;;  %v226_v25 = vpack.c.bf16 %v204_v22, %v203_v21  ;;  %v205_v27 = vld [vmem:[%s852_s6 + $0x40] sm:$0xff]  ;;  %v219_v29 = vld [vmem:[%s852_s6 + $0xb0] sm:$0xff] }
  0x1f   : > { %v233_v26 = vpack.c.bf16 %v218_v24, %v217_v23  ;;  %v206_v28 = vld [vmem:[%s852_s6 + $0x48] sm:$0xff]  ;;  %v220_v30 = vld [vmem:[%s852_s6 + $0xb8] sm:$0xff]  ;;  %v207_v33 = vld [vmem:[%s852_s6 + $0x50] sm:$0xff] }
  0x20   : > { %v227_v31 = vpack.c.bf16 %v206_v28, %v205_v27  ;;  %v234_v32 = vpack.c.bf16 %v220_v30, %v219_v29  ;;  %v208_v34 = vld [vmem:[%s852_s6 + $0x58] sm:$0xff]  ;;  %v221_v35 = vld [vmem:[%s852_s6 + $0xc0] sm:$0xff]  ;;  %v222_v36 = vld [vmem:[%s852_s6 + $0xc8] sm:$0xff] }
  0x21   : > { %v228_v37 = vpack.c.bf16 %v208_v34, %v207_v33  ;;  %v235_v38 = vpack.c.bf16 %v222_v36, %v221_v35  ;;  %v209_v39 = vld [vmem:[%s852_s6 + $0x60] sm:$0xff]  ;;  %v210_v40 = vld [vmem:[%s852_s6 + $0x68] sm:$0xff] }
  0x22   : > { %v229_v41 = vpack.c.bf16 %v210_v40, %v209_v39 }
  0x24   : > { %597 = vmatmul.mubr.msk.bf16.gmra.mrb[4].mxu0 %vm259_vm1, %v224_v13 }
  0x25   : > { %625 = vmatmul.mubr.msk.bf16.gmra.mrb[4].mxu1 %vm259_vm1, %v231_v14  ;;  %600 = vmatprep.mubr.msk.bf16.mxu0 %vm758_vm0, %v757_v1 }
  0x26   : > { %628 = vmatprep.mubr.msk.bf16.mxu1 %vm758_vm0, %v757_v1 }
  0x2c   : > { %601 = vmatmul.mubr.msk.bf16.gmra.mrb[8].mxu0 %vm259_vm1, %v225_v19 }
  0x2d   : > { %629 = vmatmul.mubr.msk.bf16.gmra.mrb[8].mxu1 %vm259_vm1, %v232_v20  ;;  %604 = vmatprep.mubr.msk.bf16.mxu0 %vm758_vm0, %v757_v1 }
  0x2e   : > { %632 = vmatprep.mubr.msk.bf16.mxu1 %vm758_vm0, %v757_v1 }
  0x34   : > { %605 = vmatmul.mubr.msk.bf16.gmra.mrb[12].mxu0 %vm259_vm1, %v226_v25 }
  0x35   : > { %633 = vmatmul.mubr.msk.bf16.gmra.mrb[12].mxu1 %vm259_vm1, %v233_v26  ;;  %608 = vmatprep.mubr.msk.bf16.mxu0 %vm758_vm0, %v757_v1 }
  0x36   : > { %636 = vmatprep.mubr.msk.bf16.mxu1 %vm758_vm0, %v757_v1 }
  0x3c   : > { %609 = vmatmul.mubr.msk.bf16.gmra.mrb[16].mxu0 %vm259_vm1, %v227_v31 }
  0x3d   : > { %637 = vmatmul.mubr.msk.bf16.gmra.mrb[16].mxu1 %vm259_vm1, %v234_v32  ;;  %612 = vmatprep.mubr.msk.bf16.mxu0 %vm758_vm0, %v757_v1 }
  0x3e   : > { %640 = vmatprep.mubr.msk.bf16.mxu1 %vm758_vm0, %v757_v1 }
  0x44   : > { %613 = vmatmul.mubr.msk.bf16.gmra.mrb[20].mxu0 %vm259_vm1, %v228_v37 }
  0x45   : > { %641 = vmatmul.mubr.msk.bf16.gmra.mrb[20].mxu1 %vm259_vm1, %v235_v38  ;;  %616 = vmatprep.mubr.msk.bf16.mxu0 %vm758_vm0, %v757_v1 }
  0x4c   : > { %617 = vmatmul.mubr.msk.bf16.gmra.mrb[24].mxu0 %vm259_vm1, %v229_v41 }
  0xef   : > { %v333_v43 = vpop.f32.mrb[0].mxu0 }
  0xf0   : > { %v334_v44 = vadd.f32 %v921_v42, %v333_v43  ;;  %v594_v45 = vpop.f32.mrb[1].mxu0  ;;  %v389_v46 = vpop.f32.mrb[0].mxu1 }
  0xf1   : > { %v336_v47 = vpop.f32.mrb[2].mxu0  ;;  %v390_v48 = vadd.f32 %v921_v42, %v389_v46  ;;  %v622_v49 = vpop.f32.mrb[1].mxu1 }
  0xf2   : > { %436 = vst [vmem:[%s925_s11] sm:$0xff] %v334_v44  ;;  %v337_v50 = vadd.f32 %v921_v42, %v336_v47  ;;  %v595_v51 = vpop.f32.mrb[3].mxu0  ;;  %v392_v52 = vpop.f32.mrb[2].mxu1 }
  0xf3   : > { %450 = vst [vmem:[%s925_s11 + $0x70] sm:$0xff] %v390_v48  ;;  %v393_v53 = vadd.f32 %v921_v42, %v392_v52  ;;  %v623_v54 = vpop.f32.mrb[3].mxu1 }
  0xf4   : > { %437 = vst [vmem:[%s925_s11 + $0x8] sm:$0xff] %v337_v50 }
  0xf5   : > { %451 = vst [vmem:[%s925_s11 + $0x78] sm:$0xff] %v393_v53 }
  0xf7   : > { %v341_v55 = vpop.f32.mrb[4].mxu0 }
  0xf8   : > { %v342_v56 = vadd.f32 %v921_v42, %v341_v55  ;;  %v598_v57 = vpop.f32.mrb[5].mxu0  ;;  %v397_v58 = vpop.f32.mrb[4].mxu1 }
  0xf9   : > { %v344_v59 = vpop.f32.mrb[6].mxu0  ;;  %v398_v60 = vadd.f32 %v921_v42, %v397_v58  ;;  %v626_v61 = vpop.f32.mrb[5].mxu1 }
  0xfa   : > { %438 = vst [vmem:[%s925_s11 + $0x10] sm:$0xff] %v342_v56  ;;  %v345_v62 = vadd.f32 %v921_v42, %v344_v59  ;;  %v599_v63 = vpop.f32.mrb[7].mxu0  ;;  %v400_v0 = vpop.f32.mrb[6].mxu1 }
  0xfb   : > { %452 = vst [vmem:[%s925_s11 + $0x80] sm:$0xff] %v398_v60  ;;  %v401_v1 = vadd.f32 %v921_v42, %v400_v0  ;;  %v627_v2 = vpop.f32.mrb[7].mxu1 }
  0xfc   : > { %439 = vst [vmem:[%s925_s11 + $0x18] sm:$0xff] %v345_v62 }
  0xfd   : > { %453 = vst [vmem:[%s925_s11 + $0x88] sm:$0xff] %v401_v1 }
  0xff   : > { %v349_v3 = vpop.f32.mrb[8].mxu0 }
 0x100   : > { %v350_v4 = vadd.f32 %v921_v42, %v349_v3  ;;  %v602_v5 = vpop.f32.mrb[9].mxu0  ;;  %v405_v6 = vpop.f32.mrb[8].mxu1 }
 0x101   : > { %v352_v7 = vpop.f32.mrb[10].mxu0  ;;  %v406_v8 = vadd.f32 %v921_v42, %v405_v6  ;;  %v630_v9 = vpop.f32.mrb[9].mxu1 }
 0x102   : > { %440 = vst [vmem:[%s925_s11 + $0x20] sm:$0xff] %v350_v4  ;;  %v353_v10 = vadd.f32 %v921_v42, %v352_v7  ;;  %v603_v11 = vpop.f32.mrb[11].mxu0  ;;  %v408_v12 = vpop.f32.mrb[10].mxu1 }
 0x103   : > { %454 = vst [vmem:[%s925_s11 + $0x90] sm:$0xff] %v406_v8  ;;  %v409_v13 = vadd.f32 %v921_v42, %v408_v12  ;;  %v631_v14 = vpop.f32.mrb[11].mxu1 }
 0x104   : > { %441 = vst [vmem:[%s925_s11 + $0x28] sm:$0xff] %v353_v10 }
 0x105   : > { %455 = vst [vmem:[%s925_s11 + $0x98] sm:$0xff] %v409_v13 }
 0x107   : > { %v357_v15 = vpop.f32.mrb[12].mxu0 }
 0x108   : > { %v358_v16 = vadd.f32 %v921_v42, %v357_v15  ;;  %v606_v17 = vpop.f32.mrb[13].mxu0  ;;  %v413_v18 = vpop.f32.mrb[12].mxu1 }
 0x109   : > { %v360_v19 = vpop.f32.mrb[14].mxu0  ;;  %v414_v20 = vadd.f32 %v921_v42, %v413_v18  ;;  %v634_v21 = vpop.f32.mrb[13].mxu1 }
 0x10a   : > { %442 = vst [vmem:[%s925_s11 + $0x30] sm:$0xff] %v358_v16  ;;  %v361_v22 = vadd.f32 %v921_v42, %v360_v19  ;;  %v607_v23 = vpop.f32.mrb[15].mxu0  ;;  %v416_v24 = vpop.f32.mrb[14].mxu1 }
 0x10b   : > { %456 = vst [vmem:[%s925_s11 + $0xa0] sm:$0xff] %v414_v20  ;;  %v417_v25 = vadd.f32 %v921_v42, %v416_v24  ;;  %v635_v26 = vpop.f32.mrb[15].mxu1 }
 0x10c   : > { %443 = vst [vmem:[%s925_s11 + $0x38] sm:$0xff] %v361_v22 }
 0x10d   : > { %457 = vst [vmem:[%s925_s11 + $0xa8] sm:$0xff] %v417_v25 }
 0x10f   : > { %v365_v27 = vpop.f32.mrb[16].mxu0 }
 0x110   : > { %v366_v28 = vadd.f32 %v921_v42, %v365_v27  ;;  %v610_v29 = vpop.f32.mrb[17].mxu0  ;;  %v421_v30 = vpop.f32.mrb[16].mxu1 }
 0x111   : > { %v368_v31 = vpop.f32.mrb[18].mxu0  ;;  %v422_v32 = vadd.f32 %v921_v42, %v421_v30  ;;  %v638_v33 = vpop.f32.mrb[17].mxu1 }
 0x112   : > { %444 = vst [vmem:[%s925_s11 + $0x40] sm:$0xff] %v366_v28  ;;  %v369_v34 = vadd.f32 %v921_v42, %v368_v31  ;;  %v611_v35 = vpop.f32.mrb[19].mxu0  ;;  %v424_v36 = vpop.f32.mrb[18].mxu1 }
 0x113   : > { %458 = vst [vmem:[%s925_s11 + $0xb0] sm:$0xff] %v422_v32  ;;  %v425_v37 = vadd.f32 %v921_v42, %v424_v36  ;;  %v639_v38 = vpop.f32.mrb[19].mxu1 }
 0x114   : > { %445 = vst [vmem:[%s925_s11 + $0x48] sm:$0xff] %v369_v34 }
 0x115   : > { %459 = vst [vmem:[%s925_s11 + $0xb8] sm:$0xff] %v425_v37 }
 0x117   : > { %v373_v39 = vpop.f32.mrb[20].mxu0 }
 0x118   : > { %v374_v40 = vadd.f32 %v921_v42, %v373_v39  ;;  %v614_v41 = vpop.f32.mrb[21].mxu0  ;;  %v429_v43 = vpop.f32.mrb[20].mxu1 }
 0x119   : > { %v376_v44 = vpop.f32.mrb[22].mxu0  ;;  %v430_v45 = vadd.f32 %v921_v42, %v429_v43  ;;  %v642_v46 = vpop.f32.mrb[21].mxu1 }
 0x11a   : > { %446 = vst [vmem:[%s925_s11 + $0x50] sm:$0xff] %v374_v40  ;;  %v377_v47 = vadd.f32 %v921_v42, %v376_v44  ;;  %v615_v48 = vpop.f32.mrb[23].mxu0  ;;  %v432_v49 = vpop.f32.mrb[22].mxu1 }
 0x11b   : > { %460 = vst [vmem:[%s925_s11 + $0xc0] sm:$0xff] %v430_v45  ;;  %v433_v50 = vadd.f32 %v921_v42, %v432_v49  ;;  %v643_v51 = vpop.f32.mrb[23].mxu1 }
 0x11c   : > { %447 = vst [vmem:[%s925_s11 + $0x58] sm:$0xff] %v377_v47 }
 0x11d   : > { %461 = vst [vmem:[%s925_s11 + $0xc8] sm:$0xff] %v433_v50 }
 0x11e   : > { %469 = sbr.rel (!%p820_p5) target bundleno = 321 (0x141), region = 36 }
 0x11f   : > { %v381_v52 = vpop.f32.mrb[24].mxu0 }
 0x120   : > { %v382_v53 = vadd.f32 %v921_v42, %v381_v52  ;;  %v618_v54 = vpop.f32.mrb[25].mxu0 }
 0x121   : > { %v384_v55 = vpop.f32.mrb[26].mxu0 }
 0x122   : > { %448 = vst [vmem:[%s925_s11 + $0x60] sm:$0xff] %v382_v53  ;;  %v385_v56 = vadd.f32 %v921_v42, %v384_v55  ;;  %v619_v57 = vpop.f32.mrb[27].mxu0 }
 0x124   : > { %449 = vst [vmem:[%s925_s11 + $0x68] sm:$0xff] %v385_v56 }
 0x125   : > { %s1051_s19 = smov (!%p472_p11, %s471_s19), 26 }
 0x126   : > { %s984_s20 = sshll.u32 %s1051_s19, 7 }
 0x127   : > { %s476_s24 = ssub.s32 3328, %s984_s20 }
 0x128   : > { %477 = vsyncadd %s979_s17, %s476_s24  ;;  %p566_p12 = scmp.ne.s32.totalorder %s984_s20, 0  ;;  %s572_s25 = smul.u32 3328, %s803_s16 }
 0x129   : > { %s482_s26 = sshll.u32 %s925_s11, 4  ;;  %s759_s30 = smov [#allocation2]   ;;  %s996_s26 = int_to_ptr.vmem [resolvable:$true] %s482_s26 }
 0x12a   : > { %s994_s29 = scalar_lea.hbm %s1043_s3, %s572_s25  ;;  %s693_s28 = scalar_lea.vmem %s996_s26, %s984_s20 }
 0x12b   : > { %p694_p13 = scmp.ne.s32.totalorder %s996_s26, %s693_s28  ;;  %s697_s4 = sshll.u32 %s759_s30, 4  ;;  %s698_s4 = int_to_ptr.vmem [resolvable:$false] %s697_s4 }
 0x12c   : > { %s699_s16 = scalar_lea.vmem %s698_s4, 6656  ;;  %p700_p2 = scmp.lt.s32.totalorder %s996_s26, %s698_s4 }
 0x12d   : > { %p695_p0 = pnand %p694_p13, %p566_p12  ;;  %p701_p3 = scmp.lt.s32.totalorder %s699_s16, %s693_s28 }
 0x12f   : > { %p696_p1 = pneg %p695_p0  ;;  %p702_p4 = por %p701_p3, %p700_p2 }
 0x131   : > { %p703_p5 = pnand %p702_p4, %p696_p1 }
 0x133   : > { %706 = shalt.err (!%p703_p5)
}
 0x134   : > { %s707_s5 = scalar_lea.hbm %s994_s29, %s984_s20  ;;  %s711_s8 = scalar_lea.hbm %s1043_s3, 12800 }
 0x135   : > { %p708_p7 = scmp.ne.s32.totalorder %s994_s29, %s707_s5  ;;  %p712_p10 = scmp.lt.u32.totalorder %s994_s29, %s1043_s3 }
 0x136   : > { %p713_p11 = scmp.lt.u32.totalorder %s711_s8, %s707_s5  ;;  %p715_p0 = scmp.lt.u32.totalorder %s707_s5, %s994_s29 }
 0x137   : > { %p709_p8 = pnand %p708_p7, %p566_p12 }
 0x138   : > { %p714_p13 = por %p713_p11, %p712_p10 }
 0x139   : > { %p710_p9 = pneg %p709_p8 }
 0x13a   : > { %p716_p1 = por %p715_p0, %p714_p13 }
 0x13c   : > { %p717_p2 = pnand %p716_p1, %p710_p9 }
 0x13e   : > { %720 = shalt.err (!%p717_p2)
}
 0x13f   : > { %s760_s11 = smov 128   ;;  %s761_s19 = smov 8  }
 0x140   : > { %488 = dma.vmem_to_hbm [thread:$0]  (%p566_p12), %s996_s26, %s984_s20, %s994_s29, %s979_s17, %s760_s11, %s760_s11, %s761_s19  }
 0x141 PF: > { %p654_p3 = scmp.ge.s32.totalorder %s755_s15, 2  ;;  %s497_s24 = sand.u32 1, %s743_s12  }
 0x142   : > { %s498_s25 = scalar_lea.sflag [#allocation3], %s497_s24 }
 0x143   : > { %p651_p4 = pnand %p654_p3, %p824_p6 }
 0x145   : > { %738 = dma.done.wait (!%p651_p4), %s498_s25, 3328  }
 0x146   : > { %740 = vsyncadd (!%p651_p4), %s498_s25, 4294963968  ;;  %p13_p5 = scmp.ge.s32.totalorder %s807_s18, 6   ;;  %s1046_s12 = smov %s747_s13 }
 0x147   : > { %s1047_s13 = smov %s751_s14  ;;  %s1048_s14 = smov %s818_s21 }
 0x148   : > { %s1049_s15 = smov %s807_s18  ;;  %15 = sbr.rel (!%p13_p5) target bundleno = 3 (0x3), region = 67 }
 0x14f   :  { %503 = vsyncpa [#allocation3], 1 }
 0x150   :  { %505 = vsyncpa [#allocation3 + $0x1], 1 }

</bundles_post_ra>
